<compile_context>
chip_gen: v6e
topology: v6e:2x2x1
jax: 0.10.0
libtpu: 0.0.40
codegen_flags: <defaults>
</compile_context>

<pallas_src>
import functools

import jax
import jax.numpy as jnp
from jax.experimental import pallas as pl
from jax.experimental.pallas import tpu as pltpu

_MIB = 1024 * 1024
# Widest lane-dense layouts first: wide unmasked vector stores + shorter grid.
_LANE_CHOICES = (2048, 1024, 512, 256, 128)
# Per-operand block-size clamps (byte-based -> dtype independent).
_MAX_BLOCK_BYTES = 8 * _MIB
_MIN_BLOCK_BYTES = 1 * _MIB


def _vmem_capacity_bytes():
    """Generation-aware VMEM capacity (v5e/v6e: 128 MiB; v7x: 64 MiB/TC)."""
    try:
        cap = getattr(pltpu.get_tpu_info(), "vmem_capacity_bytes", None)
        if cap:
            return int(cap)
    except Exception:
        pass
    return 64 * _MIB  # conservative fallback (v7x per-TensorCore VMEM)


def _choose_lanes(n):
    """Widest lane count that divides n exactly (None if n % 128 != 0)."""
    for lanes in _LANE_CHOICES:
        if n % lanes == 0:
            return lanes
    return None


def _plan_blocks(rows, lanes, itemsize, n_streams, f32_tmp):
    """Byte-based, VMEM-capacity-aware block sizing.

    n_streams: HBM streams in the pipeline (2 inputs for the reduce path,
               2 inputs + 1 output for 'none'); each is double-buffered.
    f32_tmp:   estimated number of block-sized f32 intermediates the kernel
               body materializes in VMEM.
    Returns (block_rows, n_blocks, tail_rows, vmem_limit_bytes).
    """
    cap = _vmem_capacity_bytes()
    budget = min(cap // 2, 40 * _MIB)                 # headroom for Mosaic scratch
    bytes_per_elem = n_streams * 2 * itemsize + f32_tmp * 4
    block_elems = budget // bytes_per_elem
    block_elems = max(_MIN_BLOCK_BYTES // itemsize,
                      min(_MAX_BLOCK_BYTES // itemsize, block_elems))
    target_rows = max(32, (block_elems // lanes) // 32 * 32)
    block_rows = rows if rows <= target_rows else target_rows
    n_blocks = pl.cdiv(rows, block_rows)
    tail_rows = rows - (n_blocks - 1) * block_rows
    if tail_rows == block_rows:
        tail_rows = 0  # every block is full -> no in-kernel masking needed
    working = block_rows * lanes * bytes_per_elem
    vmem_limit = working + max(working // 4, 2 * _MIB)
    vmem_limit = max(16 * _MIB, min(vmem_limit, cap - 16 * _MIB))
    return block_rows, n_blocks, tail_rows, int(vmem_limit)


# --------------------------------------------------------------------------
# reduction='none'
# --------------------------------------------------------------------------
def _abs_diff_kernel(x_ref, y_ref, o_ref):
    """|x - y| elementwise, computed in the input dtype."""
    o_ref[...] = jnp.abs(x_ref[...] - y_ref[...])


def _abs_diff_2d(x2, y2):
    rows, lanes = x2.shape
    block_rows, n_blocks, _, vmem_limit = _plan_blocks(
        rows, lanes, x2.dtype.itemsize, n_streams=3, f32_tmp=1)
    return pl.pallas_call(
        _abs_diff_kernel,
        out_shape=jax.ShapeDtypeStruct((rows, lanes), x2.dtype),
        grid_spec=pltpu.PrefetchScalarGridSpec(
            num_scalar_prefetch=0,
            grid=(n_blocks,),
            in_specs=[
                pl.BlockSpec((block_rows, lanes), lambda i: (i, 0)),
                pl.BlockSpec((block_rows, lanes), lambda i: (i, 0)),
            ],
            out_specs=pl.BlockSpec((block_rows, lanes), lambda i: (i, 0)),
        ),
        compiler_params=pltpu.CompilerParams(
            dimension_semantics=("parallel",),
            vmem_limit_bytes=vmem_limit),
    )(x2, y2)


# --------------------------------------------------------------------------
# reduction='mean' / 'sum'
# --------------------------------------------------------------------------
def _make_reduce_kernel(n_inner, n_blocks, tail_rows):
    def kernel(x_ref, y_ref, out_ref, acc_ref):
        p = pl.program_id(0)
        i = pl.program_id(1)
        blk = p * n_inner + i  # global block index (may overhang when odd)

        @pl.when(i == 0)
        def _():
            acc_ref[...] = jnp.zeros_like(acc_ref)

        @pl.when(blk < n_blocks)
        def _():
            a = jnp.abs(x_ref[...].astype(jnp.float32)
                        - y_ref[...].astype(jnp.float32))
            if tail_rows:
                # Only the final global block is partial; its out-of-bounds
                # rows contain unspecified data -> zero before accumulating.
                row_ids = jax.lax.broadcasted_iota(jnp.int32, a.shape, 0)
                limit = jnp.where(blk == n_blocks - 1, tail_rows, a.shape[0])
                a = jnp.where(row_ids < limit, a, 0.0)
            # Row-direction reduce (VPU adds, hidden under DMA); the expensive
            # cross-lane reduce happens exactly once, below.
            acc_ref[...] += jnp.sum(a, axis=0, keepdims=True)

        @pl.when(i == pl.num_programs(1) - 1)
        def _():
            out_ref[...] = jnp.sum(acc_ref[...]).reshape(1, 1, 1)

    return kernel


def _abs_sum_2d(x2, y2):
    """Sum(|x - y|) in f32 over a lane-dense 2-D view (2 partial sums)."""
    rows, lanes = x2.shape
    block_rows, n_blocks, tail_rows, vmem_limit = _plan_blocks(
        rows, lanes, x2.dtype.itemsize, n_streams=2, f32_tmp=3)

    # Always split into 2 partial sums when there is more than one block:
    # on 2-TensorCore chips (v7x) the leading 'parallel' axis puts one
    # partial on each core; on 1-TC chips it just runs sequentially.
    if n_blocks >= 2:
        n_parallel = 2
        n_inner = pl.cdiv(n_blocks, 2)
    else:
        n_parallel, n_inner = 1, n_blocks

    kernel = _make_reduce_kernel(n_inner, n_blocks, tail_rows)

    def in_map(p, i):
        # Clamp the overhanging (p=1, last) step of an odd block count to a
        # valid block; the kernel skips its accumulation via pl.when.
        return (jnp.minimum(p * n_inner + i, n_blocks - 1), 0)

    partials = pl.pallas_call(
        kernel,
        out_shape=jax.ShapeDtypeStruct((n_parallel, 1, 1), jnp.float32),
        grid_spec=pltpu.PrefetchScalarGridSpec(
            num_scalar_prefetch=0,
            grid=(n_parallel, n_inner),
            in_specs=[
                pl.BlockSpec((block_rows, lanes), in_map),
                pl.BlockSpec((block_rows, lanes), in_map),
            ],
            out_specs=pl.BlockSpec((1, 1, 1), lambda p, i: (p, 0, 0)),
            scratch_shapes=[pltpu.VMEM((1, lanes), jnp.float32)],
        ),
        compiler_params=pltpu.CompilerParams(
            dimension_semantics=("parallel", "arbitrary"),
            vmem_limit_bytes=vmem_limit),
    )(x2, y2)
    return jnp.sum(partials)


# --------------------------------------------------------------------------
# public entry point
# --------------------------------------------------------------------------
@functools.partial(jax.jit, static_argnames=("reduction",))
def l1_loss(inp, target, reduction="mean"):
    if inp.shape != target.shape:
        raise ValueError("L1Loss requires matching shapes")
    if reduction not in ("mean", "sum", "none"):
        raise ValueError(f"unknown reduction: {reduction}")

    n = inp.size
    flat_x = inp.reshape(-1)
    flat_y = target.reshape(-1)
    main = (n // 128) * 128  # lane-aligned prefix length

    if reduction == "none":
        lanes = _choose_lanes(n)
        if lanes is not None:
            out2 = _abs_diff_2d(flat_x.reshape(-1, lanes),
                                flat_y.reshape(-1, lanes))
            return out2.reshape(inp.shape)  # free reshape, no extra copies
        if main == 0:
            # Degenerate (<128-element) input: nothing to tile.
            return jnp.abs(inp - target)
        # Kernel on the 128-aligned prefix; tiny jnp epilogue for the tail.
        lanes = _choose_lanes(main)
        out_main = _abs_diff_2d(flat_x[:main].reshape(-1, lanes),
                                flat_y[:main].reshape(-1, lanes)).reshape(-1)
        out_tail = jnp.abs(flat_x[main:] - flat_y[main:])
        return jnp.concatenate([out_main, out_tail]).reshape(inp.shape)

    # 'mean' / 'sum': full reduction, accumulated in f32 inside the kernel.
    total = jnp.zeros((), jnp.float32)
    if main > 0:
        lanes = _choose_lanes(main)
        xm = flat_x if main == n else flat_x[:main]
        ym = flat_y if main == n else flat_y[:main]
        total = total + _abs_sum_2d(xm.reshape(-1, lanes),
                                    ym.reshape(-1, lanes))
    if main < n:
        # <128-element tail: negligible jnp epilogue, no pad copies.
        total = total + jnp.sum(jnp.abs(flat_x[main:].astype(jnp.float32)
                                        - flat_y[main:].astype(jnp.float32)))
    if reduction == "mean":
        total = total / n
    return total.astype(inp.dtype)


class L1Loss:
    """Thin wrapper mirroring the PyTorch module interface."""

    def __init__(self, reduction="mean"):
        self.reduction = reduction

    def __call__(self, inp, target):
        return l1_loss(inp, target, reduction=self.reduction)


if __name__ == "__main__":
    key = jax.random.PRNGKey(0)
    k1, k2, k3, k4, k5, k6 = jax.random.split(key, 6)

    # Small NCHW shapes consistent with the module.
    x = jax.random.normal(k1, (2, 4, 16, 16), dtype=jnp.float32)
    y = jax.random.normal(k2, (2, 4, 16, 16), dtype=jnp.float32)

    out_mean = l1_loss(x, y, reduction="mean")
    jax.block_until_ready(out_mean)
    ref_mean = jnp.mean(jnp.abs(x - y))
    assert jnp.allclose(out_mean, ref_mean, atol=1e-5, rtol=1e-5), (
        out_mean, ref_mean)

    out_sum = l1_loss(x, y, reduction="sum")
    jax.block_until_ready(out_sum)
    assert jnp.allclose(out_sum, jnp.sum(jnp.abs(x - y)), atol=1e-3, rtol=1e-5)

    out_none = l1_loss(x, y, reduction="none")
    jax.block_until_ready(out_none)
    assert out_none.shape == x.shape
    assert jnp.allclose(out_none, jnp.abs(x - y), atol=1e-6)

    # Odd-sized input exercises the prefix-kernel + jnp-tail paths (no pad).
    a = jax.random.normal(k3, (3, 5, 7, 11), dtype=jnp.float32)
    b = jax.random.normal(k4, (3, 5, 7, 11), dtype=jnp.float32)
    assert jnp.allclose(l1_loss(a, b, reduction="mean"),
                        jnp.mean(jnp.abs(a - b)), atol=1e-5, rtol=1e-5)
    assert jnp.allclose(l1_loss(a, b, reduction="none"),
                        jnp.abs(a - b), atol=1e-6)

    # Medium input exercises the multi-block grid and the 2-way core split
    # (including the clamped overhang step when the block count is odd).
    c = jax.random.normal(k5, (4, 4, 256, 1024), dtype=jnp.float32)
    d = jax.random.normal(k6, (4, 4, 256, 1024), dtype=jnp.float32)
    out_med = l1_loss(c, d, reduction="mean")
    jax.block_until_ready(out_med)
    assert jnp.allclose(out_med, jnp.mean(jnp.abs(c - d)),
                        atol=1e-4, rtol=1e-4), out_med

    print("KERNEL_OK")
</pallas_src>

<mosaic_0001>
module attributes {stable_mosaic.version = 11 : i64} {
  func.func @kernel(%arg0: i32, %arg1: i32, %arg2: memref<1x2048xf32, #tpu.memory_space<vmem>>, %arg3: memref<1x2048xf32, #tpu.memory_space<vmem>>, %arg4: memref<1x1x1xf32, #tpu.memory_space<vmem>>, %arg5: memref<1x2048xf32, #tpu.memory_space<vmem>>) attributes {dimension_semantics = [#tpu.dimension_semantics<parallel>, #tpu.dimension_semantics<arbitrary>], iteration_bounds = array<i64: 1, 1>, scalar_prefetch = 0 : i64, scratch_operands = 1 : i64, tpu.core_type = #tpu.core_type<tc>, window_params = [{transform_indices = @transform_0, window_bounds = array<i64: 1, 2048>}, {transform_indices = @transform_1, window_bounds = array<i64: 1, 2048>}, {transform_indices = @transform_2, window_bounds = array<i64: 1, 1, 1>}]} {
    %c1_i32 = arith.constant 1 : i32
    %0 = arith.muli %arg0, %c1_i32 : i32
    %1 = arith.addi %0, %arg1 : i32
    %c0_i32 = arith.constant 0 : i32
    %2 = arith.cmpi eq, %arg1, %c0_i32 : i32
    %3 = arith.extui %2 : i1 to i32
    %c0_i32_0 = arith.constant 0 : i32
    %4 = arith.cmpi ne, %3, %c0_i32_0 : i32
    scf.if %4 {
      %cst = arith.constant 0.000000e+00 : f32
      %11 = vector.broadcast %cst : f32 to vector<1x2048xf32>
      %c0 = arith.constant 0 : index
      %c0_5 = arith.constant 0 : index
      %12 = vector.load %arg5[%c0, %c0_5] : memref<1x2048xf32, #tpu.memory_space<vmem>>, vector<1x2048xf32>
      tpu.vector_store %arg5[%c0, %c0_5], %11 {strides = array<i32>} : memref<1x2048xf32, #tpu.memory_space<vmem>>, vector<1x2048xf32>,
    } else {
    }
    %c1_i32_1 = arith.constant 1 : i32
    %5 = arith.cmpi slt, %1, %c1_i32_1 : i32
    %6 = arith.extui %5 : i1 to i32
    %c0_i32_2 = arith.constant 0 : i32
    %7 = arith.cmpi ne, %6, %c0_i32_2 : i32
    scf.if %7 {
      %c0 = arith.constant 0 : index
      %c0_5 = arith.constant 0 : index
      %11 = vector.load %arg2[%c0, %c0_5] : memref<1x2048xf32, #tpu.memory_space<vmem>>, vector<1x2048xf32>
      %c0_6 = arith.constant 0 : index
      %c0_7 = arith.constant 0 : index
      %12 = vector.load %arg3[%c0_6, %c0_7] : memref<1x2048xf32, #tpu.memory_space<vmem>>, vector<1x2048xf32>
      %13 = arith.subf %11, %12 : vector<1x2048xf32>
      %14 = math.absf %13 : vector<1x2048xf32>
      %c0_8 = arith.constant 0 : index
      %c0_9 = arith.constant 0 : index
      %15 = vector.load %arg5[%c0_8, %c0_9] : memref<1x2048xf32, #tpu.memory_space<vmem>>, vector<1x2048xf32>
      %cst = arith.constant dense<0.000000e+00> : vector<2048xf32>
      %16 = vector.multi_reduction <add>, %14, %cst [0] : vector<1x2048xf32> to vector<2048xf32>
      %17 = vector.shape_cast %16 : vector<2048xf32> to vector<1x2048xf32>
      %18 = arith.addf %15, %17 : vector<1x2048xf32>
      %c0_10 = arith.constant 0 : index
      %c0_11 = arith.constant 0 : index
      %19 = vector.load %arg5[%c0_10, %c0_11] : memref<1x2048xf32, #tpu.memory_space<vmem>>, vector<1x2048xf32>
      tpu.vector_store %arg5[%c0_10, %c0_11], %18 {strides = array<i32>} : memref<1x2048xf32, #tpu.memory_space<vmem>>, vector<1x2048xf32>,
    } else {
    }
    %c0_i32_3 = arith.constant 0 : i32
    %8 = arith.cmpi eq, %arg1, %c0_i32_3 : i32
    %9 = arith.extui %8 : i1 to i32
    %c0_i32_4 = arith.constant 0 : i32
    %10 = arith.cmpi ne, %9, %c0_i32_4 : i32
    scf.if %10 {
      %c0 = arith.constant 0 : index
      %c0_5 = arith.constant 0 : index
      %11 = vector.load %arg5[%c0, %c0_5] : memref<1x2048xf32, #tpu.memory_space<vmem>>, vector<1x2048xf32>
      %12 = vector.shape_cast %11 : vector<1x2048xf32> to vector<1x1x2048xf32>
      %cst = arith.constant dense<0.000000e+00> : vector<1xf32>
      %13 = vector.multi_reduction <add>, %12, %cst [1, 2] : vector<1x1x2048xf32> to vector<1xf32>
      %14 = vector.shape_cast %13 : vector<1xf32> to vector<1x1x1xf32>
      %15 = vector.extract %14[0, 0, 0] : f32 from vector<1x1x1xf32>
      %16 = vector.broadcast %15 : f32 to vector<1x1x1xf32>
      %c0_6 = arith.constant 0 : index
      %c0_7 = arith.constant 0 : index
      %c0_8 = arith.constant 0 : index
      %17 = vector.load %arg4[%c0_6, %c0_7, %c0_8] : memref<1x1x1xf32, #tpu.memory_space<vmem>>, vector<1x1x1xf32>
      tpu.vector_store %arg4[%c0_6, %c0_7, %c0_8], %16 {strides = array<i32>} : memref<1x1x1xf32, #tpu.memory_space<vmem>>, vector<1x1x1xf32>,
    } else {
    }
    return
  }
  func.func @transform_0(%arg0: i32, %arg1: i32) -> (i32, i32) {
    %c1_i32 = arith.constant 1 : i32
    %0 = arith.muli %arg0, %c1_i32 : i32
    %1 = arith.addi %0, %arg1 : i32
    %c0_i32 = arith.constant 0 : i32
    %2 = arith.minsi %1, %c0_i32 : i32
    %c0_i32_0 = arith.constant 0 : i32
    %c0_i32_1 = arith.constant 0 : i32
    return %2, %c0_i32_0 : i32, i32
  }
  func.func @transform_1(%arg0: i32, %arg1: i32) -> (i32, i32) {
    %c1_i32 = arith.constant 1 : i32
    %0 = arith.muli %arg0, %c1_i32 : i32
    %1 = arith.addi %0, %arg1 : i32
    %c0_i32 = arith.constant 0 : i32
    %2 = arith.minsi %1, %c0_i32 : i32
    %c0_i32_0 = arith.constant 0 : i32
    %c0_i32_1 = arith.constant 0 : i32
    return %2, %c0_i32_0 : i32, i32
  }
  func.func @transform_2(%arg0: i32, %arg1: i32) -> (i32, i32, i32) {
    %c0_i32 = arith.constant 0 : i32
    %c0_i32_0 = arith.constant 0 : i32
    %c0_i32_1 = arith.constant 0 : i32
    return %arg0, %c0_i32, %c0_i32_0 : i32, i32, i32
  }
}

</mosaic_0001>

<bundles_post_ra>
// kernel: l1_loss.1
= control target key start
LH: loop header
LB: loop body
LE: loop exit
PB: predicated region body
PF: predicated region fallthrough
CT: control target
= control target key end

     0   :  { %v100_v2 = vlaneseq  ;;  %s322_s0 = inlined_call_operand.vmem [shape: f32[1,2048], index: 0, kind: input, shape index: {}]   ;;  %s323_s1 = inlined_call_operand.vmem [shape: f32[1,2048], index: 1, kind: input, shape index: {}]   ;;  %s324_s2 = inlined_call_operand.hbm [shape: f32[1,1,1], index: 2, kind: output, shape index: {}]  }
   0x1   :  { %v77_v0 = vld [vmem:[%s322_s0] sm:$0xff] }
   0x2   :  { %v79_v1 = vld [vmem:[%s323_s1] sm:$0xff] }
   0x3   :  { %v81_v3 = vsub.f32 %v77_v0, %v79_v1 }
   0x4   :  { %7 = vsyncpa [#allocation4], 0  ;;  %v101_v4 = vshrl.u32 %v100_v2, 7  ;;  %v78_v10 = vld [vmem:[%s322_s0 + $0x8] sm:$0xff]  ;;  %vm180_vm0 = vcmask 1040384   ;;  %s275_s0 = smov [#allocation3]  }
   0x5   :  { %v83_v5 = vand.u32 2147483647, %v81_v3  ;;  %v80_v11 = vld [vmem:[%s323_s1 + $0x8] sm:$0xff]  ;;  %s230_s1 = sshll.u32 %s275_s0, 4  ;;  %vm222_vm1 = vcmask 0   ;;  %s231_s1 = int_to_ptr.vmem [resolvable:$true] %s230_s1 }
   0x6   :  { %v102_v6 = vsub.s32 0, %v101_v4  ;;  %v106_v7 = vsub.s32 1, %v101_v4  ;;  %v110_v8 = vsub.s32 2, %v101_v4  ;;  %v114_v9 = vsub.s32 3, %v101_v4  ;;  %s253_s18 = scalar_lea.vmem %s231_s1, 16  ;;  %s257_s19 = scalar_lea.vmem %s231_s1, 32 }
   0x7   :  { %v118_v15 = vsub.s32 4, %v101_v4  ;;  %v122_v17 = vsub.s32 5, %v101_v4  ;;  %v82_v18 = vsub.f32 %v78_v10, %v80_v11  ;;  %v126_v19 = vsub.s32 6, %v101_v4  ;;  %p254_p0 = scmp.ne.s32.totalorder %s231_s1, %s253_s18  ;;  %p258_p1 = scmp.lt.s32.totalorder %s231_s1, %s231_s1 }
   0x8   :  { %v103_v12 = vrot.slane %v83_v5, %v102_v6  ;;  %v107_v13 = vrot.slane %v83_v5, %v106_v7  ;;  %v111_v14 = vrot.slane %v83_v5, %v110_v8  ;;  %v115_v16 = vrot.slane %v83_v5, %v114_v9  ;;  %p259_p2 = scmp.lt.s32.totalorder %s257_s19, %s253_s18 }
   0x9   :  { %v119_v20 = vrot.slane %v83_v5, %v118_v15  ;;  %v123_v25 = vrot.slane %v83_v5, %v122_v17  ;;  %v130_v26 = vsub.s32 7, %v101_v4  ;;  %v84_v29 = vand.u32 2147483647, %v82_v18 }
   0xa   :  { %v181_v21 = vsel %vm180_vm0, %v103_v12, 0.0  ;;  %v182_v22 = vsel %vm180_vm0, %v107_v13, 0.0  ;;  %v184_v23 = vsel %vm180_vm0, %v111_v14, 0.0  ;;  %v186_v27 = vsel %vm180_vm0, %v115_v16, 0.0  ;;  %p260_p3 = por %p259_p2, %p258_p1 }
   0xb   :  { %v183_v24 = vadd.f32 %v182_v22, %v181_v21  ;;  %v127_v30 = vrot.slane %v83_v5, %v126_v19  ;;  %v188_v31 = vsel %vm180_vm0, %v119_v20, 0.0  ;;  %v131_v33 = vrot.slane %v83_v5, %v130_v26 }
   0xc   :  { %v190_v34 = vsel %vm180_vm0, %v123_v25, 0.0  ;;  %v135_v36 = vrot.slane %v84_v29, %v102_v6  ;;  %v139_v39 = vrot.slane %v84_v29, %v106_v7  ;;  %v143_v42 = vrot.slane %v84_v29, %v110_v8  ;;  %p261_p4 = pnand %p260_p3, %p254_p0 }
   0xd   :  { %v185_v28 = vadd.f32 %v184_v23, %v183_v24  ;;  %v192_v37 = vsel %vm180_vm0, %v127_v30, 0.0  ;;  %v194_v40 = vsel %vm180_vm0, %v131_v33, 0.0  ;;  %v147_v45 = vrot.slane %v84_v29, %v114_v9 }
   0xe   :  { %v196_v43 = vsel %vm180_vm0, %v135_v36, 0.0  ;;  %v198_v46 = vsel %vm180_vm0, %v139_v39, 0.0  ;;  %v151_v48 = vrot.slane %v84_v29, %v118_v15  ;;  %v200_v49 = vsel %vm180_vm0, %v143_v42, 0.0 }
   0xf   :  { %v187_v32 = vadd.f32 %v186_v27, %v185_v28  ;;  %v155_v51 = vrot.slane %v84_v29, %v122_v17  ;;  %v202_v52 = vsel %vm180_vm0, %v147_v45, 0.0  ;;  %v159_v54 = vrot.slane %v84_v29, %v126_v19 }
  0x10   :  { %v204_v55 = vsel %vm180_vm0, %v151_v48, 0.0  ;;  %v163_v57 = vrot.slane %v84_v29, %v130_v26 }
  0x11   :  { %v189_v35 = vadd.f32 %v188_v31, %v187_v32  ;;  %v206_v58 = vsel %vm180_vm0, %v155_v51, 0.0  ;;  %v208_v60 = vsel %vm180_vm0, %v159_v54, 0.0 }
  0x12   :  { %v210_v62 = vsel %vm180_vm0, %v163_v57, 0.0 }
  0x13   :  { %v191_v38 = vadd.f32 %v190_v34, %v189_v35 }
  0x15   :  { %v193_v41 = vadd.f32 %v192_v37, %v191_v38 }
  0x17   :  { %v195_v44 = vadd.f32 %v194_v40, %v193_v41 }
  0x19   :  { %v197_v47 = vadd.f32 %v196_v43, %v195_v44 }
  0x1b   :  { %v199_v50 = vadd.f32 %v198_v46, %v197_v47 }
  0x1d   :  { %v201_v53 = vadd.f32 %v200_v49, %v199_v50 }
  0x1f   :  { %v203_v56 = vadd.f32 %v202_v52, %v201_v53 }
  0x21   :  { %v205_v59 = vadd.f32 %v204_v55, %v203_v56 }
  0x23   :  { %v207_v61 = vadd.f32 %v206_v58, %v205_v59 }
  0x25   :  { %v209_v63 = vadd.f32 %v208_v60, %v207_v61 }
  0x27   :  { %v211_v0 = vadd.f32 %v210_v62, %v209_v63 }
  0x29   :  { %212 = vadd.xlane.f32.xlu0 %v211_v0 }
  0xb2   :  { %v213_v1 = vpop.xlane.xlu0 %212 }
  0xb3   :  { %v214_v2 = vrot.slane %v213_v1, 4 }
  0xb5   :  { %v215_v3 = vadd.f32 %v214_v2, %v213_v1 }
  0xb7   :  { %v216_v4 = vrot.slane %v215_v3, 2 }
  0xb9   :  { %v217_v5 = vadd.f32 %v216_v4, %v215_v3 }
  0xbb   :  { %v218_v6 = vrot.slane %v217_v5, 1 }
  0xbd   :  { %v219_v7 = vadd.f32 %v218_v6, %v217_v5 }
  0xbf   :  { %250 = vpush %v219_v7 }
  0xf0   :  { %s251_s17 = spop %250 }
  0xf1   :  { %v221_v8 = vstv %s251_s17 }
  0xf2   :  { %223 = vst.msk [vmem:[#allocation3] sm:$0x1] %vm222_vm1, %v221_v8 }
  0xf3   :  { %264 = shalt.err (!%p261_p4)
}
  0xf4   :  { %233 = dma.vmem_to_hbm [thread:$0]  %s231_s1, 16, %s324_s2, [#allocation4]  }
  0xf5   :  { %273 = dma.done.wait [#allocation4], 16  }
  0xf6   :  { %274 = vsyncadd [#allocation4], 4294967280 }
  0xf7   :  { %237 = vsyncpa [#allocation4], 1 }

</bundles_post_ra>
